<compile_context>
chip_gen: v6e
topology: v6e:2x2x1
jax: 0.10.0
libtpu: 0.0.40
codegen_flags: <defaults>
</compile_context>

<pallas_src>
import functools

import jax
import jax.numpy as jnp
from jax.experimental import pallas as pl
from jax.experimental.pallas import tpu as pltpu

EPS = 1e-5  # InstanceNorm2d default eps


# ------------------------------- Pallas kernel ------------------------------ #

def _from_rgb_kernel(x_ref, w_ref, b_ref, o_ref, *, inv_p):
    # x_ref: (1, 3, P) one image, channels-first, spatial flattened on lanes.
    # w_ref: (tc, 3) conv weight tile; b_ref: (tc, 1) bias tile; o_ref: (1, tc, P).
    x = x_ref[0]          # (3, P)
    w = w_ref[...]        # (tc, 3)
    b = b_ref[...]        # (tc, 1)

    # 1x1 conv as 3 broadcast FMAs on the VPU (contraction depth 3 would be an almost
    # fully padded MXU pass).
    y = (w[:, 0:1] * x[0:1, :]
         + w[:, 1:2] * x[1:2, :]
         + w[:, 2:3] * x[2:3, :]
         + b)                                            # (tc, P), f32

    # InstanceNorm2d (affine=False), single pass: sum & sum-of-squares over spatial P.
    s1 = jnp.sum(y, axis=1, keepdims=True)               # (tc, 1) cross-lane reduce (XLU)
    s2 = jnp.sum(y * y, axis=1, keepdims=True)
    mean = s1 * inv_p
    var = s2 * inv_p - mean * mean                       # biased variance
    y = (y - mean) * jax.lax.rsqrt(var + EPS)            # rsqrt -> EUP

    # ReLU, write back.
    o_ref[0] = jnp.maximum(y, 0.0).astype(o_ref.dtype)


def from_rgb(x_nchw, w, b, *, chan_tile=32):
    """x_nchw: (B, 3, H, W) f32; w: (C, 3); b: (C,). Returns (B, C, H, W) f32."""
    B, cin, H, W = x_nchw.shape
    assert cin == 3
    C = w.shape[0]
    P = H * W

    tc = chan_tile
    if C % tc != 0 or (tc % 8 != 0 and tc != C):
        tc = C  # fall back to a single channel tile

    x = x_nchw.reshape(B, cin, P)
    kern = functools.partial(_from_rgb_kernel, inv_p=1.0 / P)

    out = pl.pallas_call(
        kern,
        out_shape=jax.ShapeDtypeStruct((B, C, P), jnp.float32),
        grid=(B, C // tc),
        in_specs=[
            pl.BlockSpec((1, cin, P), lambda i, j: (i, 0, 0)),   # image (shared across j)
            pl.BlockSpec((tc, cin), lambda i, j: (j, 0)),        # weight tile
            pl.BlockSpec((tc, 1), lambda i, j: (j, 0)),          # bias tile
        ],
        out_specs=pl.BlockSpec((1, tc, P), lambda i, j: (i, j, 0)),
        compiler_params=pltpu.CompilerParams(
            dimension_semantics=("parallel", "parallel"),
            vmem_limit_bytes=32 * 1024 * 1024,                   # safe on v7x's 64 MiB VMEM
        ),
    )(x, w, b.reshape(C, 1))

    return out.reshape(B, C, H, W)


# ------------------------------ reference / init ---------------------------- #

def from_rgb_ref(x_nchw, w, b):
    y = jnp.einsum("bchw,oc->bohw", x_nchw, w) + b[None, :, None, None]
    mean = jnp.mean(y, axis=(2, 3), keepdims=True)
    var = jnp.var(y, axis=(2, 3), keepdims=True)     # biased, matching InstanceNorm2d
    y = (y - mean) / jnp.sqrt(var + EPS)
    return jnp.maximum(y, 0.0)


def init_params(key, out_c):
    kw, kb = jax.random.split(key)
    fan_in, fan_out = 3, out_c                        # 1x1 kernel
    std = (2.0 / (fan_in + fan_out)) ** 0.5           # xavier_normal_
    w = std * jax.random.normal(kw, (out_c, 3), dtype=jnp.float32)
    bound = 1.0 / (fan_in ** 0.5)                     # Conv2d default bias init
    b = jax.random.uniform(kb, (out_c,), minval=-bound, maxval=bound, dtype=jnp.float32)
    return w, b


# ----------------------------------- main ----------------------------------- #

if __name__ == "__main__":
    B, H, W, OUT_C = 2, 16, 16, 64
    key = jax.random.PRNGKey(0)
    pkey, xkey = jax.random.split(key)
    w, b = init_params(pkey, OUT_C)
    x = jax.random.normal(xkey, (B, 3, H, W), dtype=jnp.float32)   # NCHW, like the module

    out = jax.block_until_ready(from_rgb(x, w, b))
    ref = from_rgb_ref(x, w, b)

    assert out.shape == (B, OUT_C, H, W)
    assert jnp.allclose(out, ref, rtol=1e-3, atol=1e-3)
    print("KERNEL_OK")
</pallas_src>

<mosaic_0001>
module attributes {stable_mosaic.version = 11 : i64} {
  func.func @_from_rgb_kernel(%arg0: i32, %arg1: i32, %arg2: memref<1x3x256xf32, #tpu.memory_space<vmem>>, %arg3: memref<32x3xf32, #tpu.memory_space<vmem>>, %arg4: memref<32x1xf32, #tpu.memory_space<vmem>>, %arg5: memref<1x32x256xf32, #tpu.memory_space<vmem>>) attributes {dimension_semantics = [#tpu.dimension_semantics<parallel>, #tpu.dimension_semantics<parallel>], iteration_bounds = array<i64: 2, 2>, scalar_prefetch = 0 : i64, scratch_operands = 0 : i64, tpu.core_type = #tpu.core_type<tc>, window_params = [{transform_indices = @transform_0, window_bounds = array<i64: 1, 3, 256>}, {transform_indices = @transform_1, window_bounds = array<i64: 32, 3>}, {transform_indices = @transform_2, window_bounds = array<i64: 32, 1>}, {transform_indices = @transform_3, window_bounds = array<i64: 1, 32, 256>}]} {
    %c0 = arith.constant 0 : index
    %c0_0 = arith.constant 0 : index
    %c0_1 = arith.constant 0 : index
    %0 = vector.load %arg2[%c0, %c0_0, %c0_1] : memref<1x3x256xf32, #tpu.memory_space<vmem>>, vector<1x3x256xf32>
    %1 = vector.shape_cast %0 : vector<1x3x256xf32> to vector<3x256xf32>
    %c0_2 = arith.constant 0 : index
    %c0_3 = arith.constant 0 : index
    %2 = vector.load %arg3[%c0_2, %c0_3] : memref<32x3xf32, #tpu.memory_space<vmem>>, vector<32x3xf32>
    %c0_4 = arith.constant 0 : index
    %c0_5 = arith.constant 0 : index
    %3 = vector.load %arg4[%c0_4, %c0_5] : memref<32x1xf32, #tpu.memory_space<vmem>>, vector<32x1xf32>
    %4 = vector.extract_strided_slice %2 {offsets = [0, 0], sizes = [32, 1], strides = [1, 1]} : vector<32x3xf32> to vector<32x1xf32>
    %5 = vector.extract_strided_slice %1 {offsets = [0, 0], sizes = [1, 256], strides = [1, 1]} : vector<3x256xf32> to vector<1x256xf32>
    %6 = vector.broadcast %4 : vector<32x1xf32> to vector<32x256xf32>
    %7 = vector.broadcast %5 : vector<1x256xf32> to vector<32x256xf32>
    %8 = arith.mulf %6, %7 : vector<32x256xf32>
    %9 = vector.extract_strided_slice %2 {offsets = [0, 1], sizes = [32, 1], strides = [1, 1]} : vector<32x3xf32> to vector<32x1xf32>
    %10 = vector.extract_strided_slice %1 {offsets = [1, 0], sizes = [1, 256], strides = [1, 1]} : vector<3x256xf32> to vector<1x256xf32>
    %11 = vector.broadcast %9 : vector<32x1xf32> to vector<32x256xf32>
    %12 = vector.broadcast %10 : vector<1x256xf32> to vector<32x256xf32>
    %13 = arith.mulf %11, %12 : vector<32x256xf32>
    %14 = arith.addf %8, %13 : vector<32x256xf32>
    %15 = vector.extract_strided_slice %2 {offsets = [0, 2], sizes = [32, 1], strides = [1, 1]} : vector<32x3xf32> to vector<32x1xf32>
    %16 = vector.extract_strided_slice %1 {offsets = [2, 0], sizes = [1, 256], strides = [1, 1]} : vector<3x256xf32> to vector<1x256xf32>
    %17 = vector.broadcast %15 : vector<32x1xf32> to vector<32x256xf32>
    %18 = vector.broadcast %16 : vector<1x256xf32> to vector<32x256xf32>
    %19 = arith.mulf %17, %18 : vector<32x256xf32>
    %20 = arith.addf %14, %19 : vector<32x256xf32>
    %21 = vector.broadcast %3 : vector<32x1xf32> to vector<32x256xf32>
    %22 = arith.addf %20, %21 : vector<32x256xf32>
    %cst = arith.constant dense<0.000000e+00> : vector<32xf32>
    %23 = vector.multi_reduction <add>, %22, %cst [1] : vector<32x256xf32> to vector<32xf32>
    %24 = vector.shape_cast %23 : vector<32xf32> to vector<32x1xf32>
    %25 = arith.mulf %22, %22 : vector<32x256xf32>
    %cst_6 = arith.constant dense<0.000000e+00> : vector<32xf32>
    %26 = vector.multi_reduction <add>, %25, %cst_6 [1] : vector<32x256xf32> to vector<32xf32>
    %27 = vector.shape_cast %26 : vector<32xf32> to vector<32x1xf32>
    %cst_7 = arith.constant 3.906250e-03 : f32
    %28 = vector.broadcast %cst_7 : f32 to vector<32x1xf32>
    %29 = arith.mulf %24, %28 : vector<32x1xf32>
    %cst_8 = arith.constant 3.906250e-03 : f32
    %30 = vector.broadcast %cst_8 : f32 to vector<32x1xf32>
    %31 = arith.mulf %27, %30 : vector<32x1xf32>
    %32 = arith.mulf %29, %29 : vector<32x1xf32>
    %33 = arith.subf %31, %32 : vector<32x1xf32>
    %34 = vector.broadcast %29 : vector<32x1xf32> to vector<32x256xf32>
    %35 = arith.subf %22, %34 : vector<32x256xf32>
    %cst_9 = arith.constant 9.99999974E-6 : f32
    %36 = vector.broadcast %cst_9 : f32 to vector<32x1xf32>
    %37 = arith.addf %33, %36 : vector<32x1xf32>
    %38 = math.rsqrt %37 : vector<32x1xf32>
    %39 = vector.broadcast %38 : vector<32x1xf32> to vector<32x256xf32>
    %40 = arith.mulf %35, %39 : vector<32x256xf32>
    %cst_10 = arith.constant 0.000000e+00 : f32
    %41 = vector.broadcast %cst_10 : f32 to vector<32x256xf32>
    %42 = arith.maximumf %40, %41 : vector<32x256xf32>
    %c0_11 = arith.constant 0 : index
    %c0_12 = arith.constant 0 : index
    %c0_13 = arith.constant 0 : index
    %43 = vector.load %arg5[%c0_11, %c0_12, %c0_13] : memref<1x32x256xf32, #tpu.memory_space<vmem>>, vector<1x32x256xf32>
    %44 = vector.shape_cast %43 : vector<1x32x256xf32> to vector<32x256xf32>
    %45 = vector.shape_cast %42 : vector<32x256xf32> to vector<1x32x256xf32>
    tpu.vector_store %arg5[%c0_11, %c0_12, %c0_13], %45 {strides = array<i32>} : memref<1x32x256xf32, #tpu.memory_space<vmem>>, vector<1x32x256xf32>,
    return
  }
  func.func @transform_0(%arg0: i32, %arg1: i32) -> (i32, i32, i32) {
    %c0_i32 = arith.constant 0 : i32
    %c0_i32_0 = arith.constant 0 : i32
    %c0_i32_1 = arith.constant 0 : i32
    return %arg0, %c0_i32, %c0_i32_0 : i32, i32, i32
  }
  func.func @transform_1(%arg0: i32, %arg1: i32) -> (i32, i32) {
    %c0_i32 = arith.constant 0 : i32
    %c0_i32_0 = arith.constant 0 : i32
    return %arg1, %c0_i32 : i32, i32
  }
  func.func @transform_2(%arg0: i32, %arg1: i32) -> (i32, i32) {
    %c0_i32 = arith.constant 0 : i32
    %c0_i32_0 = arith.constant 0 : i32
    return %arg1, %c0_i32 : i32, i32
  }
  func.func @transform_3(%arg0: i32, %arg1: i32) -> (i32, i32, i32) {
    %c0_i32 = arith.constant 0 : i32
    %c0_i32_0 = arith.constant 0 : i32
    return %arg0, %arg1, %c0_i32 : i32, i32, i32
  }
}

</mosaic_0001>

<bundles_post_ra>
// kernel: tpu_custom_call.1
= control target key start
LH: loop header
LB: loop body
LE: loop exit
PB: predicated region body
PF: predicated region fallthrough
CT: control target
= control target key end

     0   :  { %8 = vsyncpa [#allocation3], 0  ;;  %s1049_s0 = inlined_call_operand.vmem [shape: f32[2,3,256], index: 0, kind: input, shape index: {}]   ;;  %s1050_s1 = inlined_call_operand.vmem [shape: f32[64,3], index: 1, kind: input, shape index: {}]   ;;  %s1051_s2 = inlined_call_operand.vmem [shape: f32[64,1], index: 2, kind: input, shape index: {}]   ;;  %s1052_s3 = inlined_call_operand.hbm [shape: f32[2,64,256], index: 3, kind: output, shape index: {}]  }
   0x1   :  { %10 = vsyncpa [#allocation3 + $0x1], 0  ;;  %s849_s12 = smov 0   ;;  %s851_s13 = smov 0  }
   0x2   :  { %s853_s14 = smov 0   ;;  %s855_s15 = smov 0  }
   0x3   :  { %s857_s16 = smov 0   ;;  %s859_s17 = smov 0  }
   0x4   :  { %s861_s18 = smov 0   ;;  %s863_s19 = smov 0  }
   0x5 LB: > { %s617_s20 = sadd.s32 4294967295, %s821_s19   ;;  %s618_s21 = sadd.s32 4294967294, %s821_s19   ;;  %s821_s19 = sphi %s863_s19, %s16_s19   ;;  %s817_s18 = sphi %s861_s18, %s1061_s18   ;;  %s813_s17 = sphi %s859_s17, %s1060_s17   ;;  %s809_s16 = sphi %s857_s16, %s1059_s16   ;;  %s805_s15 = sphi %s855_s15, %s1058_s15   ;;  %s801_s14 = sphi %s853_s14, %s1057_s14   ;;  %s797_s13 = sphi %s851_s13, %s1056_s13   ;;  %s793_s12 = sphi %s849_s12, %s1055_s12  }
   0x6   : > { %s25_s22 = sadd.s32 1, %s813_s17  ;;  %s28_s23 = sadd.s32 1, %s817_s18 }
   0x7   : > { %p26_p0 = scmp.ge.s32.totalorder %s25_s22, 2  ;;  %p125_p1 = scmp.ne.s32.totalorder %s801_s14, %s797_s13 }
   0x8   : > { %p126_p2 = scmp.eq.s32.totalorder %s617_s20, 3  ;;  %p131_p5 = scmp.ne.s32.totalorder %s797_s13, %s793_s12 }
   0x9   : > { %s1063_s22 = smov (%p26_p0, %s25_s22), 0  ;;  %s1065_s23 = smov (!%p26_p0, %s28_s23), %s817_s18 }
   0xa   : > { %s111_s24 = ssub.s32 %s813_s17, %s1063_s22  ;;  %p900_p3 = por %p126_p2, %p125_p1 }
   0xb   : > { %p30_p4 = scmp.ge.s32.totalorder %s1065_s23, 2  ;;  %p132_p6 = scmp.eq.s32.totalorder %s618_s21, 3 }
   0xc   : > { %p621_p7 = scmp.ge.s32.totalorder %s821_s19, 1  ;;  %p176_p9 = scmp.lt.s32.totalorder %s821_s19, 5 }
   0xd   : > { %s1067_s23 = smov (%p30_p4, %s1065_s23), 0  ;;  %p909_p8 = por %p132_p6, %p131_p5 }
   0xe   : > { %s110_s27 = ssub.s32 %s817_s18, %s1067_s23  ;;  %s115_s28 = sadd.s32 1, %s801_s14 }
   0xf   : > { %s112_s29 = sor.u32 %s111_s24, %s110_s27  ;;  %p177_p10 = pnand %p621_p7, %p176_p9 }
  0x10   : > { %p113_p11 = scmp.eq.s32.totalorder %s112_s29, 0  ;;  %s625_s4 = sshll.u32 (!%p177_p10), %s805_s15, 2 }
  0x11   : > { %180 = sbr.rel (%p177_p10) target bundleno = 373 (0x175), region = 32  ;;  %p216_p12 = scmp.lt.s32.totalorder (!%p177_p10), %s625_s4, 7 }
  0x12   : > { %s918_s30 = scalar_select %p113_p11, %s801_s14, %s115_s28  }
  0x13   : > { %p210_p13 = scmp.lt.s32.totalorder (!%p177_p10), %s809_s16, 1  ;;  %s207_s29 = sand.u32 (!%p177_p10), 1, %s797_s13  }
  0x14   : > { %s632_s6 = sshll.u32 (!%p177_p10), %s809_s16, 4  ;;  %s826_s24 = smov (!%p177_p10), [#allocation2]  }
  0x15   : > { %s733_s27 = sshll.u32 (!%p177_p10), %s826_s24, 4  ;;  %s734_s27 = int_to_ptr.vmem [resolvable:$false] %s733_s27 }
  0x16   : > { %v823_v0 = vmov 1   ;;  %v824_v1 = vmov 0   ;;  %s1069_s4 = smov (!%p216_p12, %s625_s4), 7  ;;  %v825_v6 = vmov 2   ;;  %v258_v11 = vlaneseq }
  0x17   : > { %715 = vset.pattern.permute.xlu0 %v823_v0  ;;  %714 = vset.pattern.permute.xlu1 %v824_v1  ;;  %s626_s5 = sshll.u32 %s1069_s4, 3  ;;  %s622_s4 = sshll.u32 %s207_s29, 6 }
  0x18   : > { %s219_s8 = scalar_lea.vmem %s1050_s1, %s626_s5  ;;  %s225_s11 = scalar_lea.vmem %s1051_s2, %s626_s5  ;;  %v259_v14 = vshrl.u32 %v258_v11, 7 }
  0x19   : > { %v231_v2 = vld [vmem:[%s219_s8 + $0x10] sm:$0xff]  ;;  %v229_v3 = vld [vmem:[%s219_s8] sm:$0xff]  ;;  %v232_v4 = vld [vmem:[%s219_s8 + $0x18] sm:$0xff]  ;;  %s211_s20 = scalar_select %p210_p13, %s809_s16, 1 }
  0x1a   : > { %249 = vperm.xlu1 %714, %v231_v2   ;;  %285 = vperm.xlu0 %715, %v229_v3   ;;  %v230_v5 = vld [vmem:[%s219_s8 + $0x8] sm:$0xff]  ;;  %v233_v7 = vld [vmem:[%s225_s11] sm:$0xff]  ;;  %v236_v8 = vld [vmem:[%s225_s11 + $0x18] sm:$0xff]  ;;  %v260_v16 = vsub.s32 0, %v259_v14  ;;  %v264_v17 = vsub.s32 4, %v259_v14  ;;  %v302_v20 = vsub.s32 1, %v259_v14 }
  0x1b   : > { %v234_v9 = vld [vmem:[%s225_s11 + $0x8] sm:$0xff]  ;;  %v235_v10 = vld [vmem:[%s225_s11 + $0x10] sm:$0xff]  ;;  %s636_s21 = sshll.u32 %s211_s20, 3  ;;  %v306_v21 = vsub.s32 5, %v259_v14  ;;  %v352_v25 = vsub.s32 2, %v259_v14  ;;  %v356_v26 = vsub.s32 6, %v259_v14 }
  0x1c   : > { %s214_s28 = scalar_lea.vmem %s1049_s0, %s636_s21  ;;  %s637_s5 = sshll.u32 %s805_s15, 3 }
  0x1d   : > { %v228_v19 = vld [vmem:[%s214_s28] sm:$0x77]  ;;  %s209_s7 = scalar_lea.vmem [#allocation2], %s622_s4  ;;  %s514_s8 = sadd.s32 %s637_s5, %s632_s6 }
  0x1e   : > { %254 = vperm.xlu1 %714, %v232_v4   ;;  %297 = vperm.xlu0 %715, %v232_v4   ;;  %v261_v22 = vrot.slane %v228_v19, %v260_v16  ;;  %v265_v23 = vrot.slane %v228_v19, %v264_v17  ;;  %v303_v28 = vrot.slane %v228_v19, %v302_v20  ;;  %s633_s15 = sshll.u32 %s514_s8, 7  ;;  %s517_s16 = sshll.u32 %s209_s7, 4  ;;  %s994_s16 = int_to_ptr.vmem [resolvable:$true] %s517_s16 }
  0x1f   : > { %v307_v29 = vrot.slane %v228_v19, %v306_v21  ;;  %v353_v32 = vrot.slane %v228_v19, %v352_v25  ;;  %v357_v33 = vrot.slane %v228_v19, %v356_v26  ;;  %s992_s11 = scalar_lea.hbm %s1052_s3, %s633_s15  ;;  %s998_s20 = scalar_lea.sflag [#allocation3], %s207_s29 }
  0x20   : > { %v271_v30 = vrot.slane %v261_v22, %v260_v16  ;;  %v275_v31 = vrot.slane %v265_v23, %v260_v16  ;;  %v313_v36 = vrot.slane %v303_v28, %v302_v20  ;;  %s729_s21 = scalar_lea.vmem %s994_s16, 1024  ;;  %s735_s28 = scalar_lea.vmem %s734_s27, 2048 }
  0x21   : > { %v317_v37 = vrot.slane %v307_v29, %v302_v20  ;;  %v363_v42 = vrot.slane %v353_v32, %v352_v25  ;;  %v367_v43 = vrot.slane %v357_v33, %v352_v25  ;;  %p730_p0 = scmp.ne.s32.totalorder %s994_s16, %s729_s21  ;;  %p736_p4 = scmp.lt.s32.totalorder %s994_s16, %s734_s27 }
  0x22   : > { %716 = vset.pattern.permute.xlu1 %v823_v0  ;;  %718 = vset.pattern.permute.xlu0 %v825_v6  ;;  %p737_p5 = scmp.lt.s32.totalorder %s735_s28, %s729_s21 }
  0x23   : > { %289 = vperm.xlu1 %716, %v230_v5   ;;  %339 = vperm.xlu0 %718, %v230_v5   ;;  %p731_p1 = pnand %p730_p0, %p900_p3 }
  0x24   : > { %p738_p6 = por %p737_p5, %p736_p4 }
  0x25   : > { %p732_p2 = pneg %p731_p1 }
  0x27   : > { %293 = vperm.xlu1 %716, %v231_v2   ;;  %719 = vset.pattern.permute.xlu0 %v824_v1  ;;  %p739_p7 = pnand %p738_p6, %p732_p2 }
  0x28   : > { %239 = vperm.xlu0 %719, %v229_v3  }
  0x2b   : > { %717 = vset.pattern.permute.xlu1 %v825_v6 }
  0x2c   : > { %335 = vperm.xlu1 %717, %v229_v3   ;;  %244 = vperm.xlu0 %719, %v230_v5  }
  0x30   : > { %343 = vperm.xlu1 %717, %v231_v2   ;;  %386 = vperm.xlu0 %719, %v233_v7  }
  0x34   : > { %347 = vperm.xlu1 %717, %v232_v4   ;;  %401 = vperm.xlu0 %719, %v236_v8  }
  0x38   : > { %720 = vset.pattern.permute.xlu1 %v824_v1 }
  0x39   : > { %391 = vperm.xlu1 %720, %v234_v9  }
  0x3d   : > { %396 = vperm.xlu1 %720, %v235_v10  }
  0x95   : > { %v929_v12 = vpop.permute.xlu1 %249  ;;  %v286_v13 = vpop.permute.xlu0 %285 }
  0x96   : > { %v318_v40 = vmul.f32 %v313_v36, %v286_v13  ;;  %v319_v41 = vmul.f32 %v317_v37, %v286_v13  ;;  %v280_v13 = vmul.f32 %v271_v30, %v929_v12  ;;  %v281_v17 = vmul.f32 %v275_v31, %v929_v12 }
  0x99   : > { %v255_v15 = vpop.permute.xlu1 %254  ;;  %v298_v18 = vpop.permute.xlu0 %297 }
  0x9a   : > { %v282_v52 = vmul.f32 %v271_v30, %v255_v15  ;;  %v324_v53 = vmul.f32 %v313_v36, %v298_v18  ;;  %v283_v58 = vmul.f32 %v275_v31, %v255_v15  ;;  %v325_v59 = vmul.f32 %v317_v37, %v298_v18 }
  0x9c   : > { %v332_v1 = vadd.f32 %v324_v53, %v282_v52  ;;  %v333_v5 = vadd.f32 %v325_v59, %v283_v58 }
  0x9e   : > { %v290_v24 = vpop.permute.xlu1 %289  ;;  %v340_v27 = vpop.permute.xlu0 %339 }
  0x9f   : > { %v320_v62 = vmul.f32 %v313_v36, %v290_v24  ;;  %v321_v63 = vmul.f32 %v317_v37, %v290_v24  ;;  %v370_v9 = vmul.f32 %v363_v42, %v340_v27  ;;  %v371_v10 = vmul.f32 %v367_v43, %v340_v27 }
  0xa2   : > { %v294_v34 = vpop.permute.xlu1 %293 }
  0xa3   : > { %v240_v35 = vpop.permute.xlu0 %239  ;;  %v322_v6 = vmul.f32 %v313_v36, %v294_v34  ;;  %v323_v11 = vmul.f32 %v317_v37, %v294_v34 }
  0xa4   : > { %v276_v38 = vmul.f32 %v271_v30, %v240_v35  ;;  %v277_v39 = vmul.f32 %v275_v31, %v240_v35 }
  0xa5   : > { %v330_v22 = vadd.f32 %v322_v6, %v280_v13  ;;  %v331_v26 = vadd.f32 %v323_v11, %v281_v17 }
  0xa6   : > { %v326_v46 = vadd.f32 %v318_v40, %v276_v38  ;;  %v327_v47 = vadd.f32 %v319_v41, %v277_v39 }
  0xa7   : > { %v336_v44 = vpop.permute.xlu1 %335  ;;  %v245_v45 = vpop.permute.xlu0 %244 }
  0xa8   : > { %v368_v48 = vmul.f32 %v363_v42, %v336_v44  ;;  %v369_v49 = vmul.f32 %v367_v43, %v336_v44  ;;  %v278_v54 = vmul.f32 %v271_v30, %v245_v45  ;;  %v279_v55 = vmul.f32 %v275_v31, %v245_v45 }
  0xaa   : > { %v376_v50 = vadd.f32 %v368_v48, %v326_v46  ;;  %v377_v51 = vadd.f32 %v369_v49, %v327_v47  ;;  %v328_v2 = vadd.f32 %v320_v62, %v278_v54  ;;  %v329_v3 = vadd.f32 %v321_v63, %v279_v55 }
  0xab   : > { %v344_v56 = vpop.permute.xlu1 %343  ;;  %v387_v57 = vpop.permute.xlu0 %386 }
  0xac   : > { %v934_v60 = vadd.f32 %v387_v57, %v376_v50  ;;  %v936_v61 = vadd.f32 %v387_v57, %v377_v51  ;;  %v372_v14 = vmul.f32 %v363_v42, %v344_v56  ;;  %v373_v18 = vmul.f32 %v367_v43, %v344_v56 }
  0xad   : > { %v378_v20 = vadd.f32 %v370_v9, %v328_v2  ;;  %v379_v21 = vadd.f32 %v371_v10, %v329_v3 }
  0xae   : > { %v412_v0 = vadd.f32 %v936_v61, %v934_v60  ;;  %v380_v29 = vadd.f32 %v372_v14, %v330_v22  ;;  %v381_v12 = vadd.f32 %v373_v18, %v331_v26  ;;  %v424_v41 = vmul.f32 %v934_v60, %v934_v60 }
  0xaf   : > { %v348_v4 = vpop.permute.xlu1 %347  ;;  %v402_v19 = vpop.permute.xlu0 %401 }
  0xb0   : > { %v374_v7 = vmul.f32 %v363_v42, %v348_v4  ;;  %v375_v8 = vmul.f32 %v367_v43, %v348_v4  ;;  %413 = vadd.xlane.f32.xlu1 %v412_v0  ;;  %v425_v42 = vmul.f32 %v936_v61, %v936_v61 }
  0xb2   : > { %v382_v15 = vadd.f32 %v374_v7, %v332_v1  ;;  %v383_v16 = vadd.f32 %v375_v8, %v333_v5  ;;  %v432_v44 = vadd.f32 %v425_v42, %v424_v41 }
  0xb4   : > { %v942_v23 = vadd.f32 %v402_v19, %v382_v15  ;;  %v944_v24 = vadd.f32 %v402_v19, %v383_v16  ;;  %v392_v25 = vpop.permute.xlu1 %391 }
  0xb5   : > { %v946_v27 = vadd.f32 %v392_v25, %v378_v20  ;;  %v948_v28 = vadd.f32 %v392_v25, %v379_v21 }
  0xb6   : > { %v421_v30 = vadd.f32 %v944_v24, %v942_v23  ;;  %v430_v38 = vmul.f32 %v942_v23, %v942_v23  ;;  %v431_v39 = vmul.f32 %v944_v24, %v944_v24 }
  0xb7   : > { %v415_v31 = vadd.f32 %v948_v28, %v946_v27  ;;  %v426_v32 = vmul.f32 %v946_v27, %v946_v27  ;;  %v427_v33 = vmul.f32 %v948_v28, %v948_v28 }
  0xb8   : > { %v397_v34 = vpop.permute.xlu1 %396  ;;  %422 = vadd.xlane.f32.xlu1 %v421_v30  ;;  %v441_v43 = vadd.f32 %v431_v39, %v430_v38 }
  0xb9   : > { %v958_v35 = vadd.f32 %v397_v34, %v380_v29  ;;  %v960_v36 = vadd.f32 %v397_v34, %v381_v12  ;;  %416 = vadd.xlane.f32.xlu0 %v415_v31  ;;  %v435_v37 = vadd.f32 %v427_v33, %v426_v32 }
  0xbb   : > { %v418_v40 = vadd.f32 %v960_v36, %v958_v35  ;;  %v428_v45 = vmul.f32 %v958_v35, %v958_v35  ;;  %v429_v46 = vmul.f32 %v960_v36, %v960_v36 }
  0xbc   : > { %436 = vadd.xlane.f32.xlu1 %v435_v37 }
  0xbd   : > { %419 = vadd.xlane.f32.xlu0 %v418_v40  ;;  %v438_v47 = vadd.f32 %v429_v46, %v428_v45 }
  0xc0   : > { %442 = vadd.xlane.f32.xlu1 %v441_v43 }
  0xc1   : > { %433 = vadd.xlane.f32.xlu0 %v432_v44 }
  0xc5   : > { %439 = vadd.xlane.f32.xlu0 %v438_v47 }
 0x139   : > { %v414_v48 = vpop.xlane.xlu1 %413 }
 0x13a   : > { %v444_v57 = vmul.f32 0.00390625, %v414_v48 }
 0x13c   : > { %v452_v4 = vmul.f32 %v444_v57, %v444_v57  ;;  %v460_v29 = vsub.f32 %v934_v60, %v444_v57  ;;  %v461_v30 = vsub.f32 %v936_v61, %v444_v57 }
 0x141   : > { %v423_v49 = vpop.xlane.xlu1 %422 }
 0x142   : > { %v417_v50 = vpop.xlane.xlu0 %416  ;;  %v447_v54 = vmul.f32 0.00390625, %v423_v49 }
 0x143   : > { %v445_v51 = vmul.f32 0.00390625, %v417_v50 }
 0x144   : > { %v455_v63 = vmul.f32 %v447_v54, %v447_v54  ;;  %v466_v20 = vsub.f32 %v942_v23, %v447_v54  ;;  %v467_v21 = vsub.f32 %v944_v24, %v447_v54 }
 0x145   : > { %v453_v52 = vmul.f32 %v445_v51, %v445_v51  ;;  %v437_v53 = vpop.xlane.xlu1 %436  ;;  %v462_v15 = vsub.f32 %v946_v27, %v445_v51  ;;  %v463_v16 = vsub.f32 %v948_v28, %v445_v51 }
 0x146   : > { %v449_v55 = vmul.f32 0.00390625, %v437_v53  ;;  %v420_v56 = vpop.xlane.xlu0 %419 }
 0x147   : > { %v446_v2 = vmul.f32 0.00390625, %v420_v56 }
 0x148   : > { %v457_v58 = vsub.f32 %v449_v55, %v453_v52 }
 0x149   : > { %v443_v59 = vpop.xlane.xlu1 %442  ;;  %v454_v10 = vmul.f32 %v446_v2, %v446_v2  ;;  %v464_v24 = vsub.f32 %v958_v35, %v446_v2  ;;  %v465_v34 = vsub.f32 %v960_v36, %v446_v2 }
 0x14a   : > { %v469_v62 = vadd.f32 1e-05, %v457_v58  ;;  %v451_v0 = vmul.f32 0.00390625, %v443_v59  ;;  %v434_v1 = vpop.xlane.xlu0 %433 }
 0x14b   : > { %v448_v3 = vmul.f32 0.00390625, %v434_v1 }
 0x14c   : > { %721 = vrsqrt.f32 %v469_v62  ;;  %v459_v5 = vsub.f32 %v451_v0, %v455_v63 }
 0x14d   : > { %v456_v6 = vsub.f32 %v448_v3, %v452_v4 }
 0x14e   : > { %v471_v7 = vadd.f32 1e-05, %v459_v5  ;;  %v440_v8 = vpop.xlane.xlu0 %439 }
 0x14f   : > { %v468_v9 = vadd.f32 1e-05, %v456_v6  ;;  %v450_v11 = vmul.f32 0.00390625, %v440_v8 }
 0x150   : > { %723 = vrsqrt.f32 %v471_v7 }
 0x151   : > { %725 = vrsqrt.f32 %v468_v9  ;;  %v458_v13 = vsub.f32 %v450_v11, %v454_v10 }
 0x153   : > { %v470_v14 = vadd.f32 1e-05, %v458_v13 }
 0x155   : > { %727 = vrsqrt.f32 %v470_v14 }
 0x159   : > { %v722_v17 = vpop.eup %721 }
 0x15a   : > { %v478_v18 = vmul.f32 %v722_v17, %v462_v15  ;;  %v479_v19 = vmul.f32 %v722_v17, %v463_v16 }
 0x15c   : > { %v486_v22 = vmax.f32 %v478_v18, 0.0  ;;  %v487_v25 = vmax.f32 %v479_v19, 0.0 }
 0x15d   : > { %v724_v26 = vpop.eup %723 }
 0x15e   : > { %v726_v12 = vpop.eup %725  ;;  %494 = vst [vmem:[%s209_s7 + $0x10] sm:$0xff] %v486_v22  ;;  %495 = vst [vmem:[%s209_s7 + $0x18] sm:$0xff] %v487_v25  ;;  %v482_v27 = vmul.f32 %v724_v26, %v466_v20  ;;  %v483_v28 = vmul.f32 %v724_v26, %v467_v21 }
 0x15f   : > { %v476_v31 = vmul.f32 %v726_v12, %v460_v29  ;;  %v477_v32 = vmul.f32 %v726_v12, %v461_v30 }
 0x160   : > { %v490_v33 = vmax.f32 %v482_v27, 0.0  ;;  %v491_v23 = vmax.f32 %v483_v28, 0.0 }
 0x161   : > { %v484_v37 = vmax.f32 %v476_v31, 0.0  ;;  %v485_v38 = vmax.f32 %v477_v32, 0.0 }
 0x162   : > { %v728_v60 = vpop.eup %727  ;;  %498 = vst [vmem:[%s209_s7 + $0x30] sm:$0xff] %v490_v33  ;;  %499 = vst [vmem:[%s209_s7 + $0x38] sm:$0xff] %v491_v23 }
 0x163   : > { %492 = vst [vmem:[%s209_s7] sm:$0xff] %v484_v37  ;;  %493 = vst [vmem:[%s209_s7 + $0x8] sm:$0xff] %v485_v38  ;;  %v480_v61 = vmul.f32 %v728_v60, %v464_v24  ;;  %v481_v39 = vmul.f32 %v728_v60, %v465_v34 }
 0x165   : > { %v488_v35 = vmax.f32 %v480_v61, 0.0  ;;  %v489_v36 = vmax.f32 %v481_v39, 0.0 }
 0x167   : > { %496 = vst [vmem:[%s209_s7 + $0x20] sm:$0xff] %v488_v35  ;;  %497 = vst [vmem:[%s209_s7 + $0x28] sm:$0xff] %v489_v36 }
 0x168   : > { %742 = shalt.err (!%p739_p7)
}
 0x169   : > { %s743_s29 = scalar_lea.hbm %s992_s11, 1024  ;;  %s747_s6 = scalar_lea.hbm %s1052_s3, 4096 }
 0x16a   : > { %p744_p9 = scmp.ne.s32.totalorder %s992_s11, %s743_s29  ;;  %p748_p12 = scmp.lt.s32.totalorder %s992_s11, %s1052_s3 }
 0x16b   : > { %p749_p13 = scmp.lt.s32.totalorder %s747_s6, %s743_s29 }
 0x16c   : > { %p745_p10 = pnand %p744_p9, %p900_p3 }
 0x16d   : > { %p750_p0 = por %p749_p13, %p748_p12 }
 0x16e   : > { %p746_p11 = pneg %p745_p10 }
 0x170   : > { %p751_p1 = pnand %p750_p0, %p746_p11 }
 0x172   : > { %754 = shalt.err (!%p751_p1)
}
 0x173   : > { %s827_s15 = smov 256   ;;  %s828_s9 = smov 16  }
 0x174   : > { %638 = dma.vmem_to_hbm [thread:$0]  (%p900_p3), %s994_s16, 1024, %s992_s11, %s998_s20, %s827_s15, %s827_s15, %s828_s9  }
 0x175 PF: > { %p644_p2 = scmp.ge.s32.totalorder %s821_s19, 2  ;;  %s532_s10 = sand.u32 1, %s793_s12  }
 0x176   : > { %s533_s21 = scalar_lea.sflag [#allocation3], %s532_s10 }
 0x177   : > { %p641_p4 = pnand %p644_p2, %p909_p8 }
 0x179   : > { %p642_p5 = pneg %p641_p4 }
 0x17b   : > { %788 = dma.done.wait (%p642_p5), %s533_s21, 1024  }
 0x17c   : > { %790 = vsyncadd (%p642_p5), %s533_s21, 4294966272  ;;  %s16_s19 = sadd.s32 1, %s821_s19   ;;  %s1055_s12 = smov %s797_s13 }
 0x17d   : > { %p13_p6 = scmp.ge.s32.totalorder %s16_s19, 6   ;;  %s1056_s13 = smov %s801_s14 }
 0x17e   : > { %s1057_s14 = smov %s918_s30  ;;  %s1058_s15 = smov %s813_s17 }
 0x17f   : > { %s1059_s16 = smov %s817_s18  ;;  %s1060_s17 = smov %s1063_s22 }
 0x180   : > { %s1061_s18 = smov %s1067_s23  ;;  %15 = sbr.rel (!%p13_p6) target bundleno = 5 (0x5), region = 73 }
 0x185   :  { %538 = vsyncpa [#allocation3], 1 }
 0x186   :  { %540 = vsyncpa [#allocation3 + $0x1], 1 }

</bundles_post_ra>
